<compile_context>
chip_gen: v7x
topology: tpu7x:2x2x1
jax: 0.10.0
libtpu: 0.0.40
codegen_flags: <defaults>
</compile_context>

<pallas_src>
import functools

import jax
import jax.numpy as jnp
from jax.experimental import pallas as pl
from jax.experimental.pallas import tpu as pltpu

IN_FEATURES = 13
HIDDEN = 128
OUT_FEATURES = 2
W3_PAD = 128  # w3 zero-padded to 128 cols in VMEM only (MXU cost identical to N=2)


def _mlp_kernel(x_ref, w1_ref, b1_ref, w2_ref, b2_ref, w3_ref, b3_ref, o_ref,
                *, compute_dtype):
    x = x_ref[...].astype(compute_dtype)                                   # (TN, 13)
    h1 = jnp.dot(x, w1_ref[...], preferred_element_type=jnp.float32)       # (TN, 128) f32 acc
    h1 = jnp.maximum(h1 + b1_ref[...], 0.0)                                # ReLU (Dropout=identity)
    h2 = jnp.dot(h1.astype(compute_dtype), w2_ref[...],
                 preferred_element_type=jnp.float32)                       # (TN, 128)
    h2 = jnp.maximum(h2 + b2_ref[...], 0.0)                                # ReLU (Dropout=identity)
    o = jnp.dot(h2.astype(compute_dtype), w3_ref[...],
                preferred_element_type=jnp.float32)                        # (TN, 128) padded in VMEM
    # Store only the 2 real logit columns; HBM output stays (TN, 2).
    o_ref[...] = (o[:, :OUT_FEATURES] + b3_ref[...]).astype(o_ref.dtype)


def _round_up(n, m):
    return ((n + m - 1) // m) * m


def fc_forward(x, w1, b1, w2, b2, w3, b3, *, tile_n=2048, use_bf16=True):
    """3-layer MLP forward inside one tiled Pallas kernel.

    x  : (N, 13)  float32
    w1 : (13, 128)  b1 : (1, 128)
    w2 : (128, 128) b2 : (1, 128)
    w3 : (128, 2)   b3 : (1, 2)
    returns (N, 2) float32 logits
    """
    n, k = x.shape
    assert k == IN_FEATURES
    compute_dtype = jnp.bfloat16 if use_bf16 else jnp.float32

    # Matmul operands in compute dtype; biases stay f32 (added to f32 accumulators).
    w1c = w1.astype(compute_dtype)
    w2c = w2.astype(compute_dtype)
    b1c = b1.astype(jnp.float32).reshape(1, HIDDEN)
    b2c = b2.astype(jnp.float32).reshape(1, HIDDEN)
    # w3 padded to 128 columns in VMEM only (keeps the last matmul lane-dense);
    # the kernel slices the first 2 columns before storing.
    w3p = jnp.zeros((HIDDEN, W3_PAD), compute_dtype).at[:, :OUT_FEATURES].set(
        w3.astype(compute_dtype))
    b3c = b3.astype(jnp.float32).reshape(1, OUT_FEATURES)

    # Batch tiling: tile is a multiple of 8 sublanes; batch padded to whole tiles.
    n8 = _round_up(n, 8)
    tile = min(_round_up(max(tile_n, 8), 8), n8)
    # Guarantee >= 2 grid steps when the batch allows it (keeps both v7x TCs busy;
    # no-op for single-TC v5e/v6e).
    half = _round_up(pl.cdiv(n8, 2), 8)
    if n8 >= 16 and tile > half:
        tile = half
    n_padded = _round_up(n, tile)
    if n_padded != n:
        x = jnp.pad(x, ((0, n_padded - n), (0, 0)))
    grid = (n_padded // tile,)

    flops = 2 * n_padded * (IN_FEATURES * HIDDEN + HIDDEN * HIDDEN + HIDDEN * OUT_FEATURES)
    weight_bytes = (IN_FEATURES * HIDDEN + HIDDEN * HIDDEN + HIDDEN * W3_PAD) * \
        jnp.dtype(compute_dtype).itemsize
    bytes_accessed = (
        n_padded * IN_FEATURES * x.dtype.itemsize   # x read
        + n_padded * OUT_FEATURES * 4               # lane-exact f32 output write
        + weight_bytes                              # resident weights
        + (2 * HIDDEN + OUT_FEATURES) * 4)          # biases

    const = lambda shape: pl.BlockSpec(shape, lambda i: (0, 0))

    out = pl.pallas_call(
        functools.partial(_mlp_kernel, compute_dtype=compute_dtype),
        out_shape=jax.ShapeDtypeStruct((n_padded, OUT_FEATURES), jnp.float32),
        grid=grid,
        in_specs=[
            pl.BlockSpec((tile, IN_FEATURES), lambda i: (i, 0)),  # x tiles, pipelined
            const(w1c.shape), const(b1c.shape),                   # weights resident
            const(w2c.shape), const(b2c.shape),
            const(w3p.shape), const(b3c.shape),
        ],
        out_specs=pl.BlockSpec((tile, OUT_FEATURES), lambda i: (i, 0)),
        compiler_params=pltpu.CompilerParams(
            dimension_semantics=("parallel",),       # shard batch tiles across TCs (v7x)
            vmem_limit_bytes=32 * 1024 * 1024,       # safe on v7x (64 MiB physical)
        ),
        cost_estimate=pl.CostEstimate(
            flops=flops, transcendentals=0, bytes_accessed=bytes_accessed),
    )(x, w1c, b1c, w2c, b2c, w3p, b3c)

    return out[:n]


def init_params(key):
    """Matches fc._initialize_weights: weight ~ Normal(0, 0.01), bias = 0."""
    k1, k2, k3 = jax.random.split(key, 3)
    w1 = 0.01 * jax.random.normal(k1, (IN_FEATURES, HIDDEN), dtype=jnp.float32)
    b1 = jnp.zeros((1, HIDDEN), dtype=jnp.float32)
    w2 = 0.01 * jax.random.normal(k2, (HIDDEN, HIDDEN), dtype=jnp.float32)
    b2 = jnp.zeros((1, HIDDEN), dtype=jnp.float32)
    w3 = 0.01 * jax.random.normal(k3, (HIDDEN, OUT_FEATURES), dtype=jnp.float32)
    b3 = jnp.zeros((1, OUT_FEATURES), dtype=jnp.float32)
    return w1, b1, w2, b2, w3, b3


def reference_forward(x, w1, b1, w2, b2, w3, b3):
    h1 = jnp.maximum(x @ w1 + b1, 0.0)
    h2 = jnp.maximum(h1 @ w2 + b2, 0.0)
    return h2 @ w3 + b3


if __name__ == "__main__":
    key = jax.random.PRNGKey(0)
    kx, kp, kb1, kb2, kb3 = jax.random.split(key, 5)
    w1, b1, w2, b2, w3, b3 = init_params(kp)
    # Use small nonzero biases in the test so the bias-add path is exercised
    # (the module itself initializes biases to 0).
    b1 = 0.01 * jax.random.normal(kb1, b1.shape, dtype=jnp.float32)
    b2 = 0.01 * jax.random.normal(kb2, b2.shape, dtype=jnp.float32)
    b3 = 0.01 * jax.random.normal(kb3, b3.shape, dtype=jnp.float32)
    params = (w1, b1, w2, b2, w3, b3)

    atol, rtol = 2e-3, 2e-2  # bf16 MXU operands, f32 accumulation

    # Small batch (single-tile path), 13 features per sample.
    x_small = jax.random.normal(kx, (8, IN_FEATURES), dtype=jnp.float32)
    out_small = jax.block_until_ready(fc_forward(x_small, *params))
    ref_small = reference_forward(x_small, *params)
    assert out_small.shape == (8, OUT_FEATURES)
    assert jnp.allclose(out_small, ref_small, atol=atol, rtol=rtol), "mismatch (small batch)"

    # Ragged batch that exercises multi-tile grid + tail padding.
    x_big = jax.random.normal(kx, (300, IN_FEATURES), dtype=jnp.float32)
    out_big = jax.block_until_ready(fc_forward(x_big, *params, tile_n=128))
    ref_big = reference_forward(x_big, *params)
    assert out_big.shape == (300, OUT_FEATURES)
    assert jnp.allclose(out_big, ref_big, atol=atol, rtol=rtol), "mismatch (tiled batch)"

    print("KERNEL_OK")
</pallas_src>

<mosaic_0001>
module attributes {stable_mosaic.version = 11 : i64} {
  func.func @_mlp_kernel(%arg0: i32, %arg1: memref<8x13xf32, #tpu.memory_space<vmem>>, %arg2: memref<13x128xbf16, #tpu.memory_space<vmem>>, %arg3: memref<1x128xf32, #tpu.memory_space<vmem>>, %arg4: memref<128x128xbf16, #tpu.memory_space<vmem>>, %arg5: memref<1x128xf32, #tpu.memory_space<vmem>>, %arg6: memref<128x128xbf16, #tpu.memory_space<vmem>>, %arg7: memref<1x2xf32, #tpu.memory_space<vmem>>, %arg8: memref<8x2xf32, #tpu.memory_space<vmem>>) attributes {dimension_semantics = [#tpu.dimension_semantics<parallel>], iteration_bounds = array<i64: 1>, scalar_prefetch = 0 : i64, scratch_operands = 0 : i64, tpu.core_type = #tpu.core_type<tc>, window_params = [{transform_indices = @transform_0, window_bounds = array<i64: 8, 13>}, {pipeline_mode = #tpu.pipeline_mode<synchronous>, transform_indices = @transform_1, window_bounds = array<i64: 13, 128>}, {pipeline_mode = #tpu.pipeline_mode<synchronous>, transform_indices = @transform_2, window_bounds = array<i64: 1, 128>}, {pipeline_mode = #tpu.pipeline_mode<synchronous>, transform_indices = @transform_3, window_bounds = array<i64: 128, 128>}, {pipeline_mode = #tpu.pipeline_mode<synchronous>, transform_indices = @transform_4, window_bounds = array<i64: 1, 128>}, {pipeline_mode = #tpu.pipeline_mode<synchronous>, transform_indices = @transform_5, window_bounds = array<i64: 128, 128>}, {pipeline_mode = #tpu.pipeline_mode<synchronous>, transform_indices = @transform_6, window_bounds = array<i64: 1, 2>}, {transform_indices = @transform_7, window_bounds = array<i64: 8, 2>}]} {
    %c0 = arith.constant 0 : index
    %c0_0 = arith.constant 0 : index
    %0 = vector.load %arg1[%c0, %c0_0] : memref<8x13xf32, #tpu.memory_space<vmem>>, vector<8x13xf32>
    %1 = arith.truncf %0 : vector<8x13xf32> to vector<8x13xbf16>
    %c0_1 = arith.constant 0 : index
    %c0_2 = arith.constant 0 : index
    %2 = vector.load %arg2[%c0_1, %c0_2] : memref<13x128xbf16, #tpu.memory_space<vmem>>, vector<13x128xbf16>
    %cst = arith.constant dense<0.000000e+00> : vector<8x128xf32>
    %3 = tpu.matmul %1, %2, %cst {dimension_numbers = #tpu.dot_dimension_numbers<[1], [0], [0], [1], [0, 0, 1, 1], [], []>} : vector<8x13xbf16>, vector<13x128xbf16>, vector<8x128xf32> -> vector<8x128xf32>
    %c0_3 = arith.constant 0 : index
    %c0_4 = arith.constant 0 : index
    %4 = vector.load %arg3[%c0_3, %c0_4] : memref<1x128xf32, #tpu.memory_space<vmem>>, vector<1x128xf32>
    %5 = vector.broadcast %4 : vector<1x128xf32> to vector<8x128xf32>
    %6 = arith.addf %3, %5 : vector<8x128xf32>
    %cst_5 = arith.constant 0.000000e+00 : f32
    %7 = vector.broadcast %cst_5 : f32 to vector<8x128xf32>
    %8 = arith.maximumf %6, %7 : vector<8x128xf32>
    %9 = arith.truncf %8 : vector<8x128xf32> to vector<8x128xbf16>
    %c0_6 = arith.constant 0 : index
    %c0_7 = arith.constant 0 : index
    %10 = vector.load %arg4[%c0_6, %c0_7] : memref<128x128xbf16, #tpu.memory_space<vmem>>, vector<128x128xbf16>
    %cst_8 = arith.constant dense<0.000000e+00> : vector<8x128xf32>
    %11 = tpu.matmul %9, %10, %cst_8 {dimension_numbers = #tpu.dot_dimension_numbers<[1], [0], [0], [1], [0, 0, 1, 1], [], []>} : vector<8x128xbf16>, vector<128x128xbf16>, vector<8x128xf32> -> vector<8x128xf32>
    %c0_9 = arith.constant 0 : index
    %c0_10 = arith.constant 0 : index
    %12 = vector.load %arg5[%c0_9, %c0_10] : memref<1x128xf32, #tpu.memory_space<vmem>>, vector<1x128xf32>
    %13 = vector.broadcast %12 : vector<1x128xf32> to vector<8x128xf32>
    %14 = arith.addf %11, %13 : vector<8x128xf32>
    %cst_11 = arith.constant 0.000000e+00 : f32
    %15 = vector.broadcast %cst_11 : f32 to vector<8x128xf32>
    %16 = arith.maximumf %14, %15 : vector<8x128xf32>
    %17 = arith.truncf %16 : vector<8x128xf32> to vector<8x128xbf16>
    %c0_12 = arith.constant 0 : index
    %c0_13 = arith.constant 0 : index
    %18 = vector.load %arg6[%c0_12, %c0_13] : memref<128x128xbf16, #tpu.memory_space<vmem>>, vector<128x128xbf16>
    %cst_14 = arith.constant dense<0.000000e+00> : vector<8x128xf32>
    %19 = tpu.matmul %17, %18, %cst_14 {dimension_numbers = #tpu.dot_dimension_numbers<[1], [0], [0], [1], [0, 0, 1, 1], [], []>} : vector<8x128xbf16>, vector<128x128xbf16>, vector<8x128xf32> -> vector<8x128xf32>
    %20 = vector.extract_strided_slice %19 {offsets = [0, 0], sizes = [8, 2], strides = [1, 1]} : vector<8x128xf32> to vector<8x2xf32>
    %c0_15 = arith.constant 0 : index
    %c0_16 = arith.constant 0 : index
    %21 = vector.load %arg7[%c0_15, %c0_16] : memref<1x2xf32, #tpu.memory_space<vmem>>, vector<1x2xf32>
    %22 = vector.broadcast %21 : vector<1x2xf32> to vector<8x2xf32>
    %23 = arith.addf %20, %22 : vector<8x2xf32>
    %c0_17 = arith.constant 0 : index
    %c0_18 = arith.constant 0 : index
    %24 = vector.load %arg8[%c0_17, %c0_18] : memref<8x2xf32, #tpu.memory_space<vmem>>, vector<8x2xf32>
    tpu.vector_store %arg8[%c0_17, %c0_18], %23 {strides = array<i32>} : memref<8x2xf32, #tpu.memory_space<vmem>>, vector<8x2xf32>,
    return
  }
  func.func @transform_0(%arg0: i32) -> (i32, i32) {
    %c0_i32 = arith.constant 0 : i32
    %c0_i32_0 = arith.constant 0 : i32
    return %arg0, %c0_i32 : i32, i32
  }
  func.func @transform_1(%arg0: i32) -> (i32, i32) {
    %c0_i32 = arith.constant 0 : i32
    %c0_i32_0 = arith.constant 0 : i32
    %c0_i32_1 = arith.constant 0 : i32
    return %c0_i32, %c0_i32_0 : i32, i32
  }
  func.func @transform_2(%arg0: i32) -> (i32, i32) {
    %c0_i32 = arith.constant 0 : i32
    %c0_i32_0 = arith.constant 0 : i32
    %c0_i32_1 = arith.constant 0 : i32
    return %c0_i32, %c0_i32_0 : i32, i32
  }
  func.func @transform_3(%arg0: i32) -> (i32, i32) {
    %c0_i32 = arith.constant 0 : i32
    %c0_i32_0 = arith.constant 0 : i32
    %c0_i32_1 = arith.constant 0 : i32
    return %c0_i32, %c0_i32_0 : i32, i32
  }
  func.func @transform_4(%arg0: i32) -> (i32, i32) {
    %c0_i32 = arith.constant 0 : i32
    %c0_i32_0 = arith.constant 0 : i32
    %c0_i32_1 = arith.constant 0 : i32
    return %c0_i32, %c0_i32_0 : i32, i32
  }
  func.func @transform_5(%arg0: i32) -> (i32, i32) {
    %c0_i32 = arith.constant 0 : i32
    %c0_i32_0 = arith.constant 0 : i32
    %c0_i32_1 = arith.constant 0 : i32
    return %c0_i32, %c0_i32_0 : i32, i32
  }
  func.func @transform_6(%arg0: i32) -> (i32, i32) {
    %c0_i32 = arith.constant 0 : i32
    %c0_i32_0 = arith.constant 0 : i32
    %c0_i32_1 = arith.constant 0 : i32
    return %c0_i32, %c0_i32_0 : i32, i32
  }
  func.func @transform_7(%arg0: i32) -> (i32, i32) {
    %c0_i32 = arith.constant 0 : i32
    %c0_i32_0 = arith.constant 0 : i32
    return %arg0, %c0_i32 : i32, i32
  }
}

</mosaic_0001>

<bundles_post_ra>
// kernel: tpu_custom_call.1
= control target key start
LH: loop header
LB: loop body
LE: loop exit
PB: predicated region body
PF: predicated region fallthrough
CT: control target
= control target key end

     0   :  { %12 = vsyncpa [#allocation3], 0  ;;  %s731_s0 = inlined_call_operand.hbm [shape: f32[8,13], index: 0, kind: input, shape index: {}]   ;;  %s732_s1 = inlined_call_operand.hbm [shape: bf16[13,128], index: 1, kind: input, shape index: {}]   ;;  %s733_s2 = inlined_call_operand.vmem [shape: f32[1,128], index: 2, kind: input, shape index: {}]   ;;  %s734_s3 = inlined_call_operand.hbm [shape: bf16[128,128], index: 3, kind: input, shape index: {}]   ;;  %s735_s4 = inlined_call_operand.vmem [shape: f32[1,128], index: 4, kind: input, shape index: {}]   ;;  %s736_s5 = inlined_call_operand.hbm [shape: bf16[128,128], index: 5, kind: input, shape index: {}]   ;;  %s737_s6 = inlined_call_operand.vmem [shape: f32[1,2], index: 6, kind: input, shape index: {}]   ;;  %s738_s7 = inlined_call_operand.vmem [shape: f32[8,2], index: 7, kind: output, shape index: {}]  }
   0x1   :  { %13 = vsyncpa [#allocation5], 0 }
   0x2   :  { %14 = vsyncpa [#allocation8], 0  ;;  %s590_s24 = smov [#allocation4]   ;;  %s496_s28 = scalar_lea.hbm %s732_s1, 128 }
   0x3   :  { %s30_s25 = sshll.u32 %s590_s24, 4  ;;  %p497_p0 = scmp.ne.s32.totalorder %s732_s1, %s496_s28  ;;  %s31_s25 = int_to_ptr.vmem [resolvable:$true] %s30_s25 }
   0x4   :  { %p500_p1 = scmp.lt.u32.totalorder %s496_s28, %s732_s1 }
   0x6   :  { %p502_p2 = pnand %p500_p1, %p497_p0 }
   0x8   :  { %505 = shalt.err (!%p502_p2)
}
   0x9   :  { %s506_s10 = scalar_lea.vmem %s31_s25, 128  ;;  %p511_p4 = scmp.lt.s32.totalorder %s31_s25, %s31_s25 }
   0xa   :  { %p507_p3 = scmp.ne.s32.totalorder %s31_s25, %s506_s10  ;;  %p512_p5 = scmp.lt.s32.totalorder %s506_s10, %s506_s10 }
   0xc   :  { %p513_p6 = por %p512_p5, %p511_p4 }
   0xe   :  { %p514_p7 = pnand %p513_p6, %p507_p3 }
  0x10   :  { %517 = shalt.err (!%p514_p7)
}
  0x11   :  { %s591_s11 = smov 64   ;;  %s592_s12 = smov 4  }
  0x12   :  { %36 = dma.hbm_to_vmem [thread:$0]  %s732_s1, 128, %s31_s25, [#allocation5], %s591_s11, %s591_s11, %s592_s12  }
  0x13   :  { %s593_s15 = smov [#allocation2]   ;;  %s594_s17 = smov [#allocation6]  }
  0x14   :  { %s21_s16 = sshll.u32 %s593_s15, 4  ;;  %s44_s18 = sshll.u32 %s594_s17, 4  ;;  %s22_s16 = int_to_ptr.vmem [resolvable:$true] %s21_s16  ;;  %s45_s18 = int_to_ptr.vmem [resolvable:$true] %s44_s18 }
  0x15   :  { %s518_s21 = scalar_lea.hbm %s731_s0, 128 }
  0x16   :  { %p519_p8 = scmp.ne.s32.totalorder %s731_s0, %s518_s21  ;;  %p522_p9 = scmp.lt.u32.totalorder %s518_s21, %s731_s0 }
  0x18   :  { %p524_p10 = pnand %p522_p9, %p519_p8 }
  0x1a   :  { %527 = shalt.err (!%p524_p10)
}
  0x1b   :  { %s528_s1 = scalar_lea.vmem %s22_s16, 128  ;;  %p533_p12 = scmp.lt.s32.totalorder %s22_s16, %s22_s16 }
  0x1c   :  { %p529_p11 = scmp.ne.s32.totalorder %s22_s16, %s528_s1  ;;  %p534_p13 = scmp.lt.s32.totalorder %s528_s1, %s528_s1 }
  0x1e   :  { %p535_p0 = por %p534_p13, %p533_p12 }
  0x20   :  { %p536_p1 = pnand %p535_p0, %p529_p11 }
  0x22   :  { %539 = shalt.err (!%p536_p1)
}
  0x23   :  { %24 = dma.hbm_to_vmem [thread:$0]  %s731_s0, 128, %s22_s16, [#allocation3]  }
  0x24   :  { %s540_s30 = scalar_lea.hbm %s734_s3, 1024 }
  0x25   :  { %p541_p2 = scmp.ne.s32.totalorder %s734_s3, %s540_s30  ;;  %p544_p3 = scmp.lt.u32.totalorder %s540_s30, %s734_s3 }
  0x27   :  { %p546_p4 = pnand %p544_p3, %p541_p2 }
  0x29   :  { %549 = shalt.err (!%p546_p4)
}
  0x2a   :  { %s550_s14 = scalar_lea.vmem %s45_s18, 1024  ;;  %p555_p6 = scmp.lt.s32.totalorder %s45_s18, %s45_s18 }
  0x2b   :  { %p551_p5 = scmp.ne.s32.totalorder %s45_s18, %s550_s14  ;;  %p556_p7 = scmp.lt.s32.totalorder %s550_s14, %s550_s14 }
  0x2d   :  { %p557_p8 = por %p556_p7, %p555_p6 }
  0x2f   :  { %p558_p9 = pnand %p557_p8, %p551_p5 }
  0x31   :  { %561 = shalt.err (!%p558_p9)
}
  0x32   :  { %50 = dma.hbm_to_vmem [thread:$0]  %s734_s3, 1024, %s45_s18, [#allocation5], %s591_s11, %s591_s11, %s592_s12  }
  0x33   :  { %s595_s16 = smov [#allocation7]   ;;  %s562_s21 = scalar_lea.hbm %s736_s5, 1024 }
  0x34   :  { %s58_s17 = sshll.u32 %s595_s16, 4  ;;  %p563_p10 = scmp.ne.s32.totalorder %s736_s5, %s562_s21  ;;  %s59_s17 = int_to_ptr.vmem [resolvable:$true] %s58_s17 }
  0x35   :  { %p566_p11 = scmp.lt.u32.totalorder %s562_s21, %s736_s5 }
  0x37   :  { %p568_p12 = pnand %p566_p11, %p563_p10 }
  0x39   :  { %571 = shalt.err (!%p568_p12)
}
  0x3a   :  { %s572_s1 = scalar_lea.vmem %s59_s17, 1024  ;;  %p577_p0 = scmp.lt.s32.totalorder %s59_s17, %s59_s17 }
  0x3b   :  { %p573_p13 = scmp.ne.s32.totalorder %s59_s17, %s572_s1  ;;  %p578_p1 = scmp.lt.s32.totalorder %s572_s1, %s572_s1 }
  0x3d   :  { %p579_p2 = por %p578_p1, %p577_p0 }
  0x3f   :  { %p580_p3 = pnand %p579_p2, %p573_p13 }
  0x41   :  { %583 = shalt.err (!%p580_p3)
}
  0x42   :  { %64 = dma.hbm_to_vmem [thread:$0]  %s736_s5, 1024, %s59_s17, [#allocation8], %s591_s11, %s591_s11, %s592_s12  }
  0x43   :  { %584 = dma.done.wait [#allocation3], 128  }
  0x44   :  { %585 = vsyncadd [#allocation3], 4294967168 }
  0x45   :  { %586 = dma.done.wait [#allocation5], 1152  }
  0x46   :  { %587 = vsyncadd [#allocation5], 4294966144 }
  0x47   :  { %588 = dma.done.wait [#allocation8], 1024  }
  0x48   :  { %589 = vsyncadd [#allocation8], 4294966272  ;;  %vm100_vm0 = vcmask 1045504   ;;  %v596_v0 = vmov 0.0   ;;  %vm597_vm1 = vmmov 0   ;;  %vm101_vm2 = vcmask 1046528  }
  0x49   :  { %424 = vmatprep.subr.bf16.mxu0 %v596_v0  ;;  %430 = vmatprep.subr.bf16.mxu1 %v596_v0  ;;  %v598_v1 = vmov 65535   ;;  %v479_v4 = vld [vmem:[#allocation4] sm:$0x7f]   ;;  %v80_v5 = vld [vmem:[#allocation2] sm:$0xff]  ;;  %v480_v7 = vld [vmem:[#allocation6] sm:$0xff]   ;;  %vm96_vm3 = vcmask 105472  }
  0x4a   :  { %426 = vmatprep.mubr.msk.bf16.mxu0 %vm597_vm1, %v596_v0  ;;  %446 = vmatprep.mubr.msk.bf16.mxu1 %vm597_vm1, %v596_v0  ;;  %v102_v2 = vsel %vm100_vm0, 4294967295, %v598_v1  ;;  %v81_v8 = vpack.c.bf16 %v80_v5, %v80_v5  ;;  %v481_v9 = vld [vmem:[#allocation6 + $0x8] sm:$0xff]   ;;  %v482_v10 = vld [vmem:[#allocation6 + $0x10] sm:$0xff]   ;;  %v483_v11 = vld [vmem:[#allocation6 + $0x18] sm:$0xff]   ;;  %vm374_vm4 = vcmask 15360  }
  0x4b   :  { %v103_v3 = vsel %vm101_vm2, %v102_v2, 0  ;;  %431 = vmatpush3.bf16.msra.mxu1 %v480_v7  ;;  %v484_v12 = vld [vmem:[#allocation6 + $0x20] sm:$0xff]   ;;  %v485_v13 = vld [vmem:[#allocation6 + $0x28] sm:$0xff]   ;;  %v486_v14 = vld [vmem:[#allocation6 + $0x30] sm:$0xff]  }
  0x4c   :  { %v105_v6 = vand.u32 %v479_v4, %v103_v3  ;;  %432 = vmatprep.subr.bf16.mxu1 %v596_v0  ;;  %v487_v15 = vld [vmem:[#allocation6 + $0x38] sm:$0xff]   ;;  %v488_v16 = vld [vmem:[#allocation7] sm:$0xff]   ;;  %v489_v17 = vld [vmem:[#allocation7 + $0x8] sm:$0xff]  }
  0x4d   :  { %v490_v18 = vld [vmem:[#allocation7 + $0x10] sm:$0xff]   ;;  %v491_v19 = vld [vmem:[#allocation7 + $0x18] sm:$0xff]   ;;  %v492_v20 = vld [vmem:[#allocation7 + $0x20] sm:$0xff]  }
  0x4e   :  { %425 = vmatpush3.bf16.msra.mxu0 %v105_v6  ;;  %v493_v21 = vld [vmem:[#allocation7 + $0x28] sm:$0xff]   ;;  %v383_v22 = vld [vmem:[%s733_s2] ss:$0 sm:$0xff]  ;;  %v495_v31 = vld [vmem:[#allocation7 + $0x38] sm:$0xff]  }
  0x4f   :  { %450 = vmatprep.subr.bf16.mxu0 %v596_v0  ;;  %433 = vmatpush3.bf16.msra.mxu1 %v481_v9  ;;  %v494_v30 = vld [vmem:[#allocation7 + $0x30] sm:$0xff]  }
  0x50   :  { %434 = vmatprep.subr.bf16.mxu1 %v596_v0  ;;  %v386_v32 = vld [vmem:[%s735_s4] ss:$0 sm:$0xff] }
  0x51   :  { %427 = vmatmul.mubr.msk.bf16.vlgmr.msra.gmra.mrb[0].mxu0 %vm96_vm3, %v81_v8  ;;  %v403_v40 = vld [vmem:[%s737_s6] ss:$0 sm:$0xff] }
  0x52   :  { %466 = vmatprep.mubr.msk.bf16.mxu0 %vm597_vm1, %v596_v0  ;;  %451 = vmatpush3.bf16.msra.mxu0 %v488_v16 }
  0x53   :  { %435 = vmatpush3.bf16.msra.mxu1 %v482_v10  ;;  %452 = vmatprep.subr.bf16.mxu0 %v596_v0 }
  0x54   :  { %436 = vmatprep.subr.bf16.mxu1 %v596_v0 }
  0x56   :  { %453 = vmatpush3.bf16.msra.mxu0 %v489_v17 }
  0x57   :  { %437 = vmatpush3.bf16.msra.mxu1 %v483_v11  ;;  %454 = vmatprep.subr.bf16.mxu0 %v596_v0 }
  0x58   :  { %438 = vmatprep.subr.bf16.mxu1 %v596_v0 }
  0x5a   :  { %455 = vmatpush3.bf16.msra.mxu0 %v490_v18 }
  0x5b   :  { %439 = vmatpush3.bf16.msra.mxu1 %v484_v12  ;;  %456 = vmatprep.subr.bf16.mxu0 %v596_v0 }
  0x5c   :  { %440 = vmatprep.subr.bf16.mxu1 %v596_v0 }
  0x5e   :  { %457 = vmatpush3.bf16.msra.mxu0 %v491_v19 }
  0x5f   :  { %441 = vmatpush3.bf16.msra.mxu1 %v485_v13  ;;  %458 = vmatprep.subr.bf16.mxu0 %v596_v0 }
  0x60   :  { %442 = vmatprep.subr.bf16.mxu1 %v596_v0 }
  0x62   :  { %459 = vmatpush3.bf16.msra.mxu0 %v492_v20 }
  0x63   :  { %443 = vmatpush3.bf16.msra.mxu1 %v486_v14  ;;  %460 = vmatprep.subr.bf16.mxu0 %v596_v0 }
  0x64   :  { %444 = vmatprep.subr.bf16.mxu1 %v596_v0 }
  0x66   :  { %461 = vmatpush3.bf16.msra.mxu0 %v493_v21 }
  0x67   :  { %445 = vmatpush3.bf16.msra.mxu1 %v487_v15  ;;  %462 = vmatprep.subr.bf16.mxu0 %v596_v0 }
  0x6a   :  { %463 = vmatpush3.bf16.msra.mxu0 %v494_v30 }
  0x6b   :  { %464 = vmatprep.subr.bf16.mxu0 %v596_v0 }
  0x6e   :  { %465 = vmatpush3.bf16.msra.mxu0 %v495_v31 }
 0x124   :  { %v141_v23 = vpop.f32.mrb[0].mxu0 }
 0x125   :  { %v142_v24 = vadd.f32 %v383_v22, %v141_v23  ;;  %v428_v25 = vpop.f32.mrb[1].mxu0 }
 0x126   :  { %v144_v26 = vpop.f32.mrb[2].mxu0 }
 0x127   :  { %v147_v27 = vmax.f32 %v142_v24, 0.0  ;;  %v429_v28 = vpop.f32.mrb[3].mxu0 }
 0x129   :  { %v148_v29 = vpack.c.bf16 %v147_v27, %v147_v27 }
 0x12b   :  { %447 = vmatmul.mubr.bf16.vlgmr.msra.gmra.mrb[0].mxu1 %v148_v29 }
 0x1fe   :  { %v254_v33 = vpop.f32.mrb[0].mxu1 }
 0x1ff   :  { %v255_v34 = vadd.f32 %v386_v32, %v254_v33  ;;  %v448_v35 = vpop.f32.mrb[1].mxu1 }
 0x200   :  { %v257_v36 = vpop.f32.mrb[2].mxu1 }
 0x201   :  { %v260_v37 = vmax.f32 %v255_v34, 0.0  ;;  %v449_v38 = vpop.f32.mrb[3].mxu1 }
 0x203   :  { %v261_v39 = vpack.c.bf16 %v260_v37, %v260_v37 }
 0x205   :  { %467 = vmatmul.mubr.bf16.vlgmr.msra.gmra.mrb[4].mxu0 %v261_v39 }
 0x2d8   :  { %v360_v41 = vpop.f32.mrb[4].mxu0 }
 0x2d9   :  { %v373_v42 = vadd.f32 %v403_v40, %v360_v41  ;;  %v468_v43 = vpop.f32.mrb[5].mxu0 }
 0x2da   :  { %v363_v44 = vpop.f32.mrb[6].mxu0 }
 0x2db   :  { %375 = vst.msk [vmem:[%s738_s7] sm:$0xff] %vm374_vm4, %v373_v42  ;;  %v469_v45 = vpop.f32.mrb[7].mxu0 }
 0x2dc   :  { %380 = vsyncpa [#allocation3], 1 }
 0x2dd   :  { %381 = vsyncpa [#allocation5], 1 }
 0x2de   :  { %382 = vsyncpa [#allocation8], 1 }

</bundles_post_ra>
